<compile_context>
chip_gen: v5e
topology: v5e:2x2
jax: 0.10.0
libtpu: 0.0.40
codegen_flags: <defaults>
</compile_context>

<pallas_src>
import math
import functools

import jax
import jax.numpy as jnp
from jax.experimental import pallas as pl
from jax.experimental.pallas import tpu as pltpu


COMPUTE_DTYPE = jnp.bfloat16   # MXU-native dot operands; accumulation stays f32.


# ----------------------------------------------------------------------------
# Fused Pallas kernel: whole forward_standard pass for one batch block
# ----------------------------------------------------------------------------

def igcn_fused_kernel(x_ref, t1_ref, ginw_ref, ginb_ref,
                      w1_ref, b1_ref, w2_ref, b2_ref, tproj_ref,
                      goutw_ref, goutb_ref, o_ref,
                      *, n_layers, block_b, n_pts):
    """Grid axis 0 = independent batch blocks ("parallel").

    Activation layout: rows are (batch, node) flattened batch-major,
    shape (block_b * n_pts, C).  All reshapes only split/merge the leading
    (sublane-aligned, n_pts % 8 == 0) dims, the lane dim is never reshaped.
    """
    rows = block_b * n_pts
    f32 = jnp.float32

    # Shared T_1 operator, broadcast over batch ONCE (hoisted out of the loop).
    t1b = jnp.broadcast_to(t1_ref[...][None], (block_b, n_pts, n_pts))

    def graph_mix(x_lo):
        # Per-batch T_1 @ x.   x_lo: (rows, C) bf16  ->  (rows, C) f32.
        c = x_lo.shape[-1]
        y = jnp.einsum("bnm,bmc->bnc", t1b, x_lo.reshape(block_b, n_pts, c),
                       preferred_element_type=f32)
        return y.reshape(rows, c)

    def cheb_fused(x, wcat, b):
        # ChebConv, K=2, T_0 = I, both Chebyshev terms fused into ONE matmul:
        #     out = [x | T_1 x] @ [[W_0],[W_1]] + b
        x_lo = x.astype(COMPUTE_DTYPE)
        t1x_lo = graph_mix(x_lo).astype(COMPUTE_DTYPE)
        xcat = jnp.concatenate([x_lo, t1x_lo], axis=-1)              # (rows, 2C)
        return jnp.dot(xcat, wcat, preferred_element_type=f32) + b

    # ---- gconv_input (ChebConv, no activation).  Contraction dim is tiny
    # (coords_in = 3), so keep its two Chebyshev terms as two separate dots.
    x_lo = x_ref[...].astype(COMPUTE_DTYPE)                          # (rows, Cin)
    t1x_lo = graph_mix(x_lo).astype(COMPUTE_DTYPE)
    act = (jnp.dot(x_lo, ginw_ref[0], preferred_element_type=f32)
           + jnp.dot(t1x_lo, ginw_ref[1], preferred_element_type=f32)
           + ginb_ref[...])                                          # (rows, H) f32
    hid = act.shape[-1]

    # ---- residual _ResChebGC_diff layers, statically unrolled (no grid steps).
    # TODO(synk): GraAttenLayer attention stage left as identity (source not provided).
    for l in range(n_layers):
        tp = tproj_ref[l]                                            # (block_b, H)
        tp_rows = jnp.broadcast_to(
            tp[:, None, :], (block_b, n_pts, hid)).reshape(rows, hid)
        h = jnp.maximum(cheb_fused(act, w1_ref[l], b1_ref[l]), 0.0)  # gconv1 + ReLU
        h = h + tp_rows                                              # + temb_proj(silu(temb))
        h = jnp.maximum(cheb_fused(h, w2_ref[l], b2_ref[l]), 0.0)    # gconv2 + ReLU
        act = act + h                                                # residual

    # ---- gconv_output (ChebConv, no activation), reassociated so the graph
    # matmul runs at width coords_out (<< H):  x@W_0 + T_1(x@W_1) + b.
    a_lo = act.astype(COMPUTE_DTYPE)
    y0 = jnp.dot(a_lo, goutw_ref[0], preferred_element_type=f32)     # (rows, Cout)
    y1 = jnp.dot(a_lo, goutw_ref[1], preferred_element_type=f32)
    out = y0 + graph_mix(y1.astype(COMPUTE_DTYPE)) + goutb_ref[...]
    o_ref[...] = out.astype(o_ref.dtype)


# ----------------------------------------------------------------------------
# Plain-JAX glue (matches the PyTorch reference semantics)
# ----------------------------------------------------------------------------

def get_timestep_embedding(timesteps, embedding_dim):
    assert timesteps.ndim == 1
    half_dim = embedding_dim // 2
    emb = math.log(10000) / (half_dim - 1)
    emb = jnp.exp(jnp.arange(half_dim, dtype=jnp.float32) * -emb)
    emb = timesteps.astype(jnp.float32)[:, None] * emb[None, :]
    emb = jnp.concatenate([jnp.sin(emb), jnp.cos(emb)], axis=1)
    if embedding_dim % 2 == 1:
        emb = jnp.pad(emb, ((0, 0), (0, 1)))
    return emb


def chebyshev_basis(adj, K=2):
    """Normalized-Laplacian Chebyshev basis [T_0, T_1] = [I, L]."""
    N = adj.shape[0]
    deg = jnp.sum(adj, axis=-1)
    d_inv_sqrt = jnp.where(deg > 0, deg ** -0.5, 0.0)
    D = jnp.diag(d_inv_sqrt)
    L = jnp.eye(N, dtype=jnp.float32) - D @ adj @ D
    basis = [jnp.eye(N, dtype=jnp.float32), L]
    for _ in range(2, K):
        basis.append(2.0 * L @ basis[-1] - basis[-2])
    return jnp.stack(basis[:K], axis=0)  # (K, N, N)


def init_params(key, *, coords_in, coords_out, hid, n_layers, adj, K=2):
    assert K == 2
    emd = hid * 4
    keys = jax.random.split(key, 4 + n_layers)

    def w(k, shape, scale=0.1):
        return scale * jax.random.normal(k, shape, dtype=jnp.float32)

    params = {
        "cheb": chebyshev_basis(adj, K),
        "temb_w0": w(keys[0], (hid, emd)),
        "temb_b0": jnp.zeros((1, emd), jnp.float32),
        "temb_w1": w(keys[1], (emd, emd)),
        "temb_b1": jnp.zeros((1, emd), jnp.float32),
        "gin_w": w(keys[2], (K, coords_in, hid)),
        "gin_b": jnp.zeros((1, hid), jnp.float32),
        "gout_w": w(keys[3], (K, hid, coords_out)),
        "gout_b": jnp.zeros((1, coords_out), jnp.float32),
        "layers": [],
    }
    for i in range(n_layers):
        k0, k1, k2 = jax.random.split(keys[4 + i], 3)
        params["layers"].append({
            "w1": w(k0, (K, hid, hid)), "b1": jnp.zeros((1, hid), jnp.float32),
            "w2": w(k1, (K, hid, hid)), "b2": jnp.zeros((1, hid), jnp.float32),
            "wt": w(k2, (emd, hid)),    "bt": jnp.zeros((1, hid), jnp.float32),
        })
    return params


@functools.partial(jax.jit, static_argnames=("block_b",))
def igcn_forward(params, x, mask, t, block_b=None):
    """forward_standard path of IGCN (eval mode), fused into one pallas_call."""
    del mask  # only consumed by the untranslated attention layers
    B, N, Cin = x.shape
    K, _, H = params["gin_w"].shape
    Cout = params["gout_w"].shape[-1]
    L = len(params["layers"])
    assert K == 2 and L >= 1
    if block_b is None:
        block_b = B
    assert B % block_b == 0
    # (8,128) tiling: rows per block must be sublane-aligned unless full.
    assert (block_b == B) or (block_b % 8 == 0 and (block_b * N) % 8 == 0)
    BN = B * N

    # --- timestep embedding -> Linear -> SiLU -> Linear (tiny; left to XLA) ---
    temb = get_timestep_embedding(t, H)                               # (B, H)
    temb = temb @ params["temb_w0"] + params["temb_b0"]
    temb = temb * jax.nn.sigmoid(temb)                                # SiLU
    temb = temb @ params["temb_w1"] + params["temb_b1"]               # (B, E)
    temb_act = temb * jax.nn.sigmoid(temb)                            # nonlinearity(temb)

    # --- per-layer temb projection; node broadcast happens IN the kernel ---
    wt = jnp.stack([l["wt"] for l in params["layers"]])               # (L, E, H)
    bt = jnp.stack([l["bt"] for l in params["layers"]])               # (L, 1, H)
    tproj = jnp.einsum("be,leh->lbh", temb_act, wt) + bt              # (L, B, H) f32

    # --- per-layer ChebConv weights, K terms pre-concatenated on contraction dim ---
    w1 = jnp.stack([l["w1"] for l in params["layers"]]).reshape(L, K * H, H)
    w2 = jnp.stack([l["w2"] for l in params["layers"]]).reshape(L, K * H, H)
    b1 = jnp.stack([l["b1"] for l in params["layers"]])               # (L, 1, H)
    b2 = jnp.stack([l["b2"] for l in params["layers"]])

    t1 = params["cheb"][1]                                            # shared (N, N) T_1

    ct = COMPUTE_DTYPE
    x_flat = x.reshape(BN, Cin).astype(jnp.float32)

    kernel = functools.partial(igcn_fused_kernel,
                               n_layers=L, block_b=block_b, n_pts=N)
    rows = block_b * N

    out_flat = pl.pallas_call(
        kernel,
        out_shape=jax.ShapeDtypeStruct((BN, Cout), jnp.float32),
        grid=(B // block_b,),
        in_specs=[
            pl.BlockSpec((rows, Cin), lambda i: (i, 0)),              # x (batch block)
            pl.BlockSpec((N, N), lambda i: (0, 0)),                   # shared T_1
            pl.BlockSpec((K, Cin, H), lambda i: (0, 0, 0)),           # gconv_input W
            pl.BlockSpec((1, H), lambda i: (0, 0)),                   # gconv_input b
            pl.BlockSpec((L, K * H, H), lambda i: (0, 0, 0)),         # all gconv1 W (fused K)
            pl.BlockSpec((L, 1, H), lambda i: (0, 0, 0)),             # all gconv1 b
            pl.BlockSpec((L, K * H, H), lambda i: (0, 0, 0)),         # all gconv2 W (fused K)
            pl.BlockSpec((L, 1, H), lambda i: (0, 0, 0)),             # all gconv2 b
            pl.BlockSpec((L, block_b, H), lambda i: (0, i, 0)),       # temb proj (batch block)
            pl.BlockSpec((K, H, Cout), lambda i: (0, 0, 0)),          # gconv_output W
            pl.BlockSpec((1, Cout), lambda i: (0, 0)),                # gconv_output b
        ],
        out_specs=pl.BlockSpec((rows, Cout), lambda i: (i, 0)),
        compiler_params=pltpu.CompilerParams(
            dimension_semantics=("parallel",),        # batch blocks are independent
            vmem_limit_bytes=32 * 1024 * 1024),       # explicit (fits all generations)
    )(x_flat, t1.astype(ct),
      params["gin_w"].astype(ct), params["gin_b"],
      w1.astype(ct), b1, w2.astype(ct), b2, tproj,
      params["gout_w"].astype(ct), params["gout_b"])

    return out_flat.reshape(B, N, Cout)


# ----------------------------------------------------------------------------
# Pure-JAX reference (f32) for correctness checking
# ----------------------------------------------------------------------------

def igcn_forward_ref(params, x, mask, t):
    del mask
    B, N, Cin = x.shape
    _, _, H = params["gin_w"].shape
    cheb = params["cheb"]                                             # (K, N, N)

    def cheb_conv(xb, w, b):
        return jnp.einsum("knm,bmc,kcd->bnd", cheb, xb, w) + b

    temb = get_timestep_embedding(t, H)
    temb = temb @ params["temb_w0"] + params["temb_b0"]
    temb = temb * jax.nn.sigmoid(temb)
    temb = temb @ params["temb_w1"] + params["temb_b1"]
    temb_act = temb * jax.nn.sigmoid(temb)

    out = cheb_conv(x, params["gin_w"], params["gin_b"])
    for layer in params["layers"]:
        res = out
        h = jax.nn.relu(cheb_conv(out, layer["w1"], layer["b1"]))
        h = h + (temb_act @ layer["wt"] + layer["bt"])[:, None, :]
        h = jax.nn.relu(cheb_conv(h, layer["w2"], layer["b2"]))
        out = res + h
    return cheb_conv(out, params["gout_w"], params["gout_b"])


# ----------------------------------------------------------------------------
# Demo
# ----------------------------------------------------------------------------

if __name__ == "__main__":
    B, N = 2, 16                    # batch, number of joints (n_pts)
    hid = 32                        # hid_dim
    coords_in, coords_out = 3, 3    # coords_dim
    n_layers = 2

    key = jax.random.PRNGKey(0)
    k_x, k_params = jax.random.split(key, 2)

    # simple chain skeleton adjacency (symmetric, no self loops)
    adj = (jnp.eye(N, k=1) + jnp.eye(N, k=-1)).astype(jnp.float32)

    params = init_params(k_params, coords_in=coords_in, coords_out=coords_out,
                         hid=hid, n_layers=n_layers, adj=adj, K=2)

    x = jax.random.normal(k_x, (B, N, coords_in), dtype=jnp.float32)
    mask = jnp.ones((B, N, N), dtype=jnp.float32)
    t = jnp.array([3, 7], dtype=jnp.int32)

    out = igcn_forward(params, x, mask, t)
    out = jax.block_until_ready(out)

    assert out.shape == (B, N, coords_out), out.shape
    assert jnp.all(jnp.isfinite(out))

    ref = igcn_forward_ref(params, x, mask, t)
    err = float(jnp.max(jnp.abs(out - ref)))
    assert err < 5e-2, f"max abs error vs f32 reference: {err}"

    print("KERNEL_OK")
</pallas_src>

<mosaic_0001>
module attributes {stable_mosaic.version = 11 : i64} {
  func.func @igcn_fused_kernel(%arg0: i32, %arg1: memref<32x3xf32, #tpu.memory_space<vmem>>, %arg2: memref<16x16xbf16, #tpu.memory_space<vmem>>, %arg3: memref<2x3x32xbf16, #tpu.memory_space<vmem>>, %arg4: memref<1x32xf32, #tpu.memory_space<vmem>>, %arg5: memref<2x64x32xbf16, #tpu.memory_space<vmem>>, %arg6: memref<2x1x32xf32, #tpu.memory_space<vmem>>, %arg7: memref<2x64x32xbf16, #tpu.memory_space<vmem>>, %arg8: memref<2x1x32xf32, #tpu.memory_space<vmem>>, %arg9: memref<2x2x32xf32, #tpu.memory_space<vmem>>, %arg10: memref<2x32x3xbf16, #tpu.memory_space<vmem>>, %arg11: memref<1x3xf32, #tpu.memory_space<vmem>>, %arg12: memref<32x3xf32, #tpu.memory_space<vmem>>) attributes {dimension_semantics = [#tpu.dimension_semantics<parallel>], iteration_bounds = array<i64: 1>, scalar_prefetch = 0 : i64, scratch_operands = 0 : i64, tpu.core_type = #tpu.core_type<tc>, window_params = [{transform_indices = @transform_0, window_bounds = array<i64: 32, 3>}, {pipeline_mode = #tpu.pipeline_mode<synchronous>, transform_indices = @transform_1, window_bounds = array<i64: 16, 16>}, {pipeline_mode = #tpu.pipeline_mode<synchronous>, transform_indices = @transform_2, window_bounds = array<i64: 2, 3, 32>}, {pipeline_mode = #tpu.pipeline_mode<synchronous>, transform_indices = @transform_3, window_bounds = array<i64: 1, 32>}, {pipeline_mode = #tpu.pipeline_mode<synchronous>, transform_indices = @transform_4, window_bounds = array<i64: 2, 64, 32>}, {pipeline_mode = #tpu.pipeline_mode<synchronous>, transform_indices = @transform_5, window_bounds = array<i64: 2, 1, 32>}, {pipeline_mode = #tpu.pipeline_mode<synchronous>, transform_indices = @transform_6, window_bounds = array<i64: 2, 64, 32>}, {pipeline_mode = #tpu.pipeline_mode<synchronous>, transform_indices = @transform_7, window_bounds = array<i64: 2, 1, 32>}, {transform_indices = @transform_8, window_bounds = array<i64: 2, 2, 32>}, {pipeline_mode = #tpu.pipeline_mode<synchronous>, transform_indices = @transform_9, window_bounds = array<i64: 2, 32, 3>}, {pipeline_mode = #tpu.pipeline_mode<synchronous>, transform_indices = @transform_10, window_bounds = array<i64: 1, 3>}, {transform_indices = @transform_11, window_bounds = array<i64: 32, 3>}]} {
    %c0 = arith.constant 0 : index
    %c0_0 = arith.constant 0 : index
    %0 = vector.load %arg2[%c0, %c0_0] : memref<16x16xbf16, #tpu.memory_space<vmem>>, vector<16x16xbf16>
    %1 = vector.shape_cast %0 : vector<16x16xbf16> to vector<1x16x16xbf16>
    %2 = vector.shape_cast %1 : vector<1x16x16xbf16> to vector<1x16x16xbf16>
    %3 = vector.broadcast %2 : vector<1x16x16xbf16> to vector<2x16x16xbf16>
    %c0_1 = arith.constant 0 : index
    %c0_2 = arith.constant 0 : index
    %4 = vector.load %arg1[%c0_1, %c0_2] : memref<32x3xf32, #tpu.memory_space<vmem>>, vector<32x3xf32>
    %5 = arith.truncf %4 : vector<32x3xf32> to vector<32x3xbf16>
    %6 = vector.shape_cast %5 : vector<32x3xbf16> to vector<2x16x3xbf16>
    "tpu.trace_start"() <{level = 10 : i32, message = "bnm,bmc->bnc"}> : () -> ()
    %cst = arith.constant dense<0.000000e+00> : vector<2x16x3xf32>
    %7 = tpu.matmul %3, %6, %cst {dimension_numbers = #tpu.dot_dimension_numbers<[2], [1], [1], [2], [0, 0, 0, 1, 1, 2], [0], [0]>} : vector<2x16x16xbf16>, vector<2x16x3xbf16>, vector<2x16x3xf32> -> vector<2x16x3xf32>
    "tpu.trace_stop"() : () -> ()
    %8 = vector.shape_cast %7 : vector<2x16x3xf32> to vector<32x3xf32>
    %9 = arith.truncf %8 : vector<32x3xf32> to vector<32x3xbf16>
    %c0_3 = arith.constant 0 : index
    %c0_4 = arith.constant 0 : index
    %c0_5 = arith.constant 0 : index
    %10 = vector.load %arg3[%c0_3, %c0_4, %c0_5] : memref<2x3x32xbf16, #tpu.memory_space<vmem>>, vector<1x3x32xbf16>
    %11 = vector.shape_cast %10 : vector<1x3x32xbf16> to vector<3x32xbf16>
    %cst_6 = arith.constant dense<0.000000e+00> : vector<32x32xf32>
    %12 = tpu.matmul %5, %11, %cst_6 {dimension_numbers = #tpu.dot_dimension_numbers<[1], [0], [0], [1], [0, 0, 1, 1], [], []>} : vector<32x3xbf16>, vector<3x32xbf16>, vector<32x32xf32> -> vector<32x32xf32>
    %c1 = arith.constant 1 : index
    %c0_7 = arith.constant 0 : index
    %c0_8 = arith.constant 0 : index
    %13 = vector.load %arg3[%c1, %c0_7, %c0_8] : memref<2x3x32xbf16, #tpu.memory_space<vmem>>, vector<1x3x32xbf16>
    %14 = vector.shape_cast %13 : vector<1x3x32xbf16> to vector<3x32xbf16>
    %cst_9 = arith.constant dense<0.000000e+00> : vector<32x32xf32>
    %15 = tpu.matmul %9, %14, %cst_9 {dimension_numbers = #tpu.dot_dimension_numbers<[1], [0], [0], [1], [0, 0, 1, 1], [], []>} : vector<32x3xbf16>, vector<3x32xbf16>, vector<32x32xf32> -> vector<32x32xf32>
    %16 = arith.addf %12, %15 : vector<32x32xf32>
    %c0_10 = arith.constant 0 : index
    %c0_11 = arith.constant 0 : index
    %17 = vector.load %arg4[%c0_10, %c0_11] : memref<1x32xf32, #tpu.memory_space<vmem>>, vector<1x32xf32>
    %18 = vector.broadcast %17 : vector<1x32xf32> to vector<32x32xf32>
    %19 = arith.addf %16, %18 : vector<32x32xf32>
    %c0_12 = arith.constant 0 : index
    %c0_13 = arith.constant 0 : index
    %c0_14 = arith.constant 0 : index
    %20 = vector.load %arg9[%c0_12, %c0_13, %c0_14] : memref<2x2x32xf32, #tpu.memory_space<vmem>>, vector<1x2x32xf32>
    %21 = vector.shape_cast %20 : vector<1x2x32xf32> to vector<2x32xf32>
    %22 = vector.shape_cast %21 : vector<2x32xf32> to vector<2x1x32xf32>
    %23 = vector.shape_cast %22 : vector<2x1x32xf32> to vector<2x1x32xf32>
    %24 = vector.broadcast %23 : vector<2x1x32xf32> to vector<2x16x32xf32>
    %25 = vector.shape_cast %24 : vector<2x16x32xf32> to vector<32x32xf32>
    %c0_15 = arith.constant 0 : index
    %c0_16 = arith.constant 0 : index
    %c0_17 = arith.constant 0 : index
    %26 = vector.load %arg5[%c0_15, %c0_16, %c0_17] : memref<2x64x32xbf16, #tpu.memory_space<vmem>>, vector<1x64x32xbf16>
    %27 = vector.shape_cast %26 : vector<1x64x32xbf16> to vector<64x32xbf16>
    %c0_18 = arith.constant 0 : index
    %c0_19 = arith.constant 0 : index
    %c0_20 = arith.constant 0 : index
    %28 = vector.load %arg6[%c0_18, %c0_19, %c0_20] : memref<2x1x32xf32, #tpu.memory_space<vmem>>, vector<1x1x32xf32>
    %29 = vector.shape_cast %28 : vector<1x1x32xf32> to vector<1x32xf32>
    %30 = arith.truncf %19 : vector<32x32xf32> to vector<32x32xbf16>
    %31 = vector.shape_cast %30 : vector<32x32xbf16> to vector<2x16x32xbf16>
    "tpu.trace_start"() <{level = 10 : i32, message = "bnm,bmc->bnc"}> : () -> ()
    %cst_21 = arith.constant dense<0.000000e+00> : vector<2x16x32xf32>
    %32 = tpu.matmul %3, %31, %cst_21 {dimension_numbers = #tpu.dot_dimension_numbers<[2], [1], [1], [2], [0, 0, 0, 1, 1, 2], [0], [0]>} : vector<2x16x16xbf16>, vector<2x16x32xbf16>, vector<2x16x32xf32> -> vector<2x16x32xf32>
    "tpu.trace_stop"() : () -> ()
    %33 = vector.shape_cast %32 : vector<2x16x32xf32> to vector<32x32xf32>
    %34 = arith.truncf %33 : vector<32x32xf32> to vector<32x32xbf16>
    %35 = tpu.concatenate %30, %34 in 1 : vector<32x32xbf16>, vector<32x32xbf16> -> vector<32x64xbf16>
    %cst_22 = arith.constant dense<0.000000e+00> : vector<32x32xf32>
    %36 = tpu.matmul %35, %27, %cst_22 {dimension_numbers = #tpu.dot_dimension_numbers<[1], [0], [0], [1], [0, 0, 1, 1], [], []>} : vector<32x64xbf16>, vector<64x32xbf16>, vector<32x32xf32> -> vector<32x32xf32>
    %37 = vector.broadcast %29 : vector<1x32xf32> to vector<32x32xf32>
    %38 = arith.addf %36, %37 : vector<32x32xf32>
    %cst_23 = arith.constant 0.000000e+00 : f32
    %39 = vector.broadcast %cst_23 : f32 to vector<32x32xf32>
    %40 = arith.maximumf %38, %39 : vector<32x32xf32>
    %41 = arith.addf %40, %25 : vector<32x32xf32>
    %c0_24 = arith.constant 0 : index
    %c0_25 = arith.constant 0 : index
    %c0_26 = arith.constant 0 : index
    %42 = vector.load %arg7[%c0_24, %c0_25, %c0_26] : memref<2x64x32xbf16, #tpu.memory_space<vmem>>, vector<1x64x32xbf16>
    %43 = vector.shape_cast %42 : vector<1x64x32xbf16> to vector<64x32xbf16>
    %c0_27 = arith.constant 0 : index
    %c0_28 = arith.constant 0 : index
    %c0_29 = arith.constant 0 : index
    %44 = vector.load %arg8[%c0_27, %c0_28, %c0_29] : memref<2x1x32xf32, #tpu.memory_space<vmem>>, vector<1x1x32xf32>
    %45 = vector.shape_cast %44 : vector<1x1x32xf32> to vector<1x32xf32>
    %46 = arith.truncf %41 : vector<32x32xf32> to vector<32x32xbf16>
    %47 = vector.shape_cast %46 : vector<32x32xbf16> to vector<2x16x32xbf16>
    "tpu.trace_start"() <{level = 10 : i32, message = "bnm,bmc->bnc"}> : () -> ()
    %cst_30 = arith.constant dense<0.000000e+00> : vector<2x16x32xf32>
    %48 = tpu.matmul %3, %47, %cst_30 {dimension_numbers = #tpu.dot_dimension_numbers<[2], [1], [1], [2], [0, 0, 0, 1, 1, 2], [0], [0]>} : vector<2x16x16xbf16>, vector<2x16x32xbf16>, vector<2x16x32xf32> -> vector<2x16x32xf32>
    "tpu.trace_stop"() : () -> ()
    %49 = vector.shape_cast %48 : vector<2x16x32xf32> to vector<32x32xf32>
    %50 = arith.truncf %49 : vector<32x32xf32> to vector<32x32xbf16>
    %51 = tpu.concatenate %46, %50 in 1 : vector<32x32xbf16>, vector<32x32xbf16> -> vector<32x64xbf16>
    %cst_31 = arith.constant dense<0.000000e+00> : vector<32x32xf32>
    %52 = tpu.matmul %51, %43, %cst_31 {dimension_numbers = #tpu.dot_dimension_numbers<[1], [0], [0], [1], [0, 0, 1, 1], [], []>} : vector<32x64xbf16>, vector<64x32xbf16>, vector<32x32xf32> -> vector<32x32xf32>
    %53 = vector.broadcast %45 : vector<1x32xf32> to vector<32x32xf32>
    %54 = arith.addf %52, %53 : vector<32x32xf32>
    %cst_32 = arith.constant 0.000000e+00 : f32
    %55 = vector.broadcast %cst_32 : f32 to vector<32x32xf32>
    %56 = arith.maximumf %54, %55 : vector<32x32xf32>
    %57 = arith.addf %19, %56 : vector<32x32xf32>
    %c1_33 = arith.constant 1 : index
    %c0_34 = arith.constant 0 : index
    %c0_35 = arith.constant 0 : index
    %58 = vector.load %arg9[%c1_33, %c0_34, %c0_35] : memref<2x2x32xf32, #tpu.memory_space<vmem>>, vector<1x2x32xf32>
    %59 = vector.shape_cast %58 : vector<1x2x32xf32> to vector<2x32xf32>
    %60 = vector.shape_cast %59 : vector<2x32xf32> to vector<2x1x32xf32>
    %61 = vector.shape_cast %60 : vector<2x1x32xf32> to vector<2x1x32xf32>
    %62 = vector.broadcast %61 : vector<2x1x32xf32> to vector<2x16x32xf32>
    %63 = vector.shape_cast %62 : vector<2x16x32xf32> to vector<32x32xf32>
    %c1_36 = arith.constant 1 : index
    %c0_37 = arith.constant 0 : index
    %c0_38 = arith.constant 0 : index
    %64 = vector.load %arg5[%c1_36, %c0_37, %c0_38] : memref<2x64x32xbf16, #tpu.memory_space<vmem>>, vector<1x64x32xbf16>
    %65 = vector.shape_cast %64 : vector<1x64x32xbf16> to vector<64x32xbf16>
    %c1_39 = arith.constant 1 : index
    %c0_40 = arith.constant 0 : index
    %c0_41 = arith.constant 0 : index
    %66 = vector.load %arg6[%c1_39, %c0_40, %c0_41] : memref<2x1x32xf32, #tpu.memory_space<vmem>>, vector<1x1x32xf32>
    %67 = vector.shape_cast %66 : vector<1x1x32xf32> to vector<1x32xf32>
    %68 = arith.truncf %57 : vector<32x32xf32> to vector<32x32xbf16>
    %69 = vector.shape_cast %68 : vector<32x32xbf16> to vector<2x16x32xbf16>
    "tpu.trace_start"() <{level = 10 : i32, message = "bnm,bmc->bnc"}> : () -> ()
    %cst_42 = arith.constant dense<0.000000e+00> : vector<2x16x32xf32>
    %70 = tpu.matmul %3, %69, %cst_42 {dimension_numbers = #tpu.dot_dimension_numbers<[2], [1], [1], [2], [0, 0, 0, 1, 1, 2], [0], [0]>} : vector<2x16x16xbf16>, vector<2x16x32xbf16>, vector<2x16x32xf32> -> vector<2x16x32xf32>
    "tpu.trace_stop"() : () -> ()
    %71 = vector.shape_cast %70 : vector<2x16x32xf32> to vector<32x32xf32>
    %72 = arith.truncf %71 : vector<32x32xf32> to vector<32x32xbf16>
    %73 = tpu.concatenate %68, %72 in 1 : vector<32x32xbf16>, vector<32x32xbf16> -> vector<32x64xbf16>
    %cst_43 = arith.constant dense<0.000000e+00> : vector<32x32xf32>
    %74 = tpu.matmul %73, %65, %cst_43 {dimension_numbers = #tpu.dot_dimension_numbers<[1], [0], [0], [1], [0, 0, 1, 1], [], []>} : vector<32x64xbf16>, vector<64x32xbf16>, vector<32x32xf32> -> vector<32x32xf32>
    %75 = vector.broadcast %67 : vector<1x32xf32> to vector<32x32xf32>
    %76 = arith.addf %74, %75 : vector<32x32xf32>
    %cst_44 = arith.constant 0.000000e+00 : f32
    %77 = vector.broadcast %cst_44 : f32 to vector<32x32xf32>
    %78 = arith.maximumf %76, %77 : vector<32x32xf32>
    %79 = arith.addf %78, %63 : vector<32x32xf32>
    %c1_45 = arith.constant 1 : index
    %c0_46 = arith.constant 0 : index
    %c0_47 = arith.constant 0 : index
    %80 = vector.load %arg7[%c1_45, %c0_46, %c0_47] : memref<2x64x32xbf16, #tpu.memory_space<vmem>>, vector<1x64x32xbf16>
    %81 = vector.shape_cast %80 : vector<1x64x32xbf16> to vector<64x32xbf16>
    %c1_48 = arith.constant 1 : index
    %c0_49 = arith.constant 0 : index
    %c0_50 = arith.constant 0 : index
    %82 = vector.load %arg8[%c1_48, %c0_49, %c0_50] : memref<2x1x32xf32, #tpu.memory_space<vmem>>, vector<1x1x32xf32>
    %83 = vector.shape_cast %82 : vector<1x1x32xf32> to vector<1x32xf32>
    %84 = arith.truncf %79 : vector<32x32xf32> to vector<32x32xbf16>
    %85 = vector.shape_cast %84 : vector<32x32xbf16> to vector<2x16x32xbf16>
    "tpu.trace_start"() <{level = 10 : i32, message = "bnm,bmc->bnc"}> : () -> ()
    %cst_51 = arith.constant dense<0.000000e+00> : vector<2x16x32xf32>
    %86 = tpu.matmul %3, %85, %cst_51 {dimension_numbers = #tpu.dot_dimension_numbers<[2], [1], [1], [2], [0, 0, 0, 1, 1, 2], [0], [0]>} : vector<2x16x16xbf16>, vector<2x16x32xbf16>, vector<2x16x32xf32> -> vector<2x16x32xf32>
    "tpu.trace_stop"() : () -> ()
    %87 = vector.shape_cast %86 : vector<2x16x32xf32> to vector<32x32xf32>
    %88 = arith.truncf %87 : vector<32x32xf32> to vector<32x32xbf16>
    %89 = tpu.concatenate %84, %88 in 1 : vector<32x32xbf16>, vector<32x32xbf16> -> vector<32x64xbf16>
    %cst_52 = arith.constant dense<0.000000e+00> : vector<32x32xf32>
    %90 = tpu.matmul %89, %81, %cst_52 {dimension_numbers = #tpu.dot_dimension_numbers<[1], [0], [0], [1], [0, 0, 1, 1], [], []>} : vector<32x64xbf16>, vector<64x32xbf16>, vector<32x32xf32> -> vector<32x32xf32>
    %91 = vector.broadcast %83 : vector<1x32xf32> to vector<32x32xf32>
    %92 = arith.addf %90, %91 : vector<32x32xf32>
    %cst_53 = arith.constant 0.000000e+00 : f32
    %93 = vector.broadcast %cst_53 : f32 to vector<32x32xf32>
    %94 = arith.maximumf %92, %93 : vector<32x32xf32>
    %95 = arith.addf %57, %94 : vector<32x32xf32>
    %96 = arith.truncf %95 : vector<32x32xf32> to vector<32x32xbf16>
    %c0_54 = arith.constant 0 : index
    %c0_55 = arith.constant 0 : index
    %c0_56 = arith.constant 0 : index
    %97 = vector.load %arg10[%c0_54, %c0_55, %c0_56] : memref<2x32x3xbf16, #tpu.memory_space<vmem>>, vector<1x32x3xbf16>
    %98 = vector.shape_cast %97 : vector<1x32x3xbf16> to vector<32x3xbf16>
    %cst_57 = arith.constant dense<0.000000e+00> : vector<32x3xf32>
    %99 = tpu.matmul %96, %98, %cst_57 {dimension_numbers = #tpu.dot_dimension_numbers<[1], [0], [0], [1], [0, 0, 1, 1], [], []>} : vector<32x32xbf16>, vector<32x3xbf16>, vector<32x3xf32> -> vector<32x3xf32>
    %c1_58 = arith.constant 1 : index
    %c0_59 = arith.constant 0 : index
    %c0_60 = arith.constant 0 : index
    %100 = vector.load %arg10[%c1_58, %c0_59, %c0_60] : memref<2x32x3xbf16, #tpu.memory_space<vmem>>, vector<1x32x3xbf16>
    %101 = vector.shape_cast %100 : vector<1x32x3xbf16> to vector<32x3xbf16>
    %cst_61 = arith.constant dense<0.000000e+00> : vector<32x3xf32>
    %102 = tpu.matmul %96, %101, %cst_61 {dimension_numbers = #tpu.dot_dimension_numbers<[1], [0], [0], [1], [0, 0, 1, 1], [], []>} : vector<32x32xbf16>, vector<32x3xbf16>, vector<32x3xf32> -> vector<32x3xf32>
    %103 = arith.truncf %102 : vector<32x3xf32> to vector<32x3xbf16>
    %104 = vector.shape_cast %103 : vector<32x3xbf16> to vector<2x16x3xbf16>
    "tpu.trace_start"() <{level = 10 : i32, message = "bnm,bmc->bnc"}> : () -> ()
    %cst_62 = arith.constant dense<0.000000e+00> : vector<2x16x3xf32>
    %105 = tpu.matmul %3, %104, %cst_62 {dimension_numbers = #tpu.dot_dimension_numbers<[2], [1], [1], [2], [0, 0, 0, 1, 1, 2], [0], [0]>} : vector<2x16x16xbf16>, vector<2x16x3xbf16>, vector<2x16x3xf32> -> vector<2x16x3xf32>
    "tpu.trace_stop"() : () -> ()
    %106 = vector.shape_cast %105 : vector<2x16x3xf32> to vector<32x3xf32>
    %107 = arith.addf %99, %106 : vector<32x3xf32>
    %c0_63 = arith.constant 0 : index
    %c0_64 = arith.constant 0 : index
    %108 = vector.load %arg11[%c0_63, %c0_64] : memref<1x3xf32, #tpu.memory_space<vmem>>, vector<1x3xf32>
    %109 = vector.broadcast %108 : vector<1x3xf32> to vector<32x3xf32>
    %110 = arith.addf %107, %109 : vector<32x3xf32>
    %c0_65 = arith.constant 0 : index
    %c0_66 = arith.constant 0 : index
    %111 = vector.load %arg12[%c0_65, %c0_66] : memref<32x3xf32, #tpu.memory_space<vmem>>, vector<32x3xf32>
    tpu.vector_store %arg12[%c0_65, %c0_66], %110 {strides = array<i32>} : memref<32x3xf32, #tpu.memory_space<vmem>>, vector<32x3xf32>,
    return
  }
  func.func @transform_0(%arg0: i32) -> (i32, i32) {
    %c0_i32 = arith.constant 0 : i32
    %c0_i32_0 = arith.constant 0 : i32
    return %arg0, %c0_i32 : i32, i32
  }
  func.func @transform_1(%arg0: i32) -> (i32, i32) {
    %c0_i32 = arith.constant 0 : i32
    %c0_i32_0 = arith.constant 0 : i32
    %c0_i32_1 = arith.constant 0 : i32
    return %c0_i32, %c0_i32_0 : i32, i32
  }
  func.func @transform_2(%arg0: i32) -> (i32, i32, i32) {
    %c0_i32 = arith.constant 0 : i32
    %c0_i32_0 = arith.constant 0 : i32
    %c0_i32_1 = arith.constant 0 : i32
    %c0_i32_2 = arith.constant 0 : i32
    return %c0_i32, %c0_i32_0, %c0_i32_1 : i32, i32, i32
  }
  func.func @transform_3(%arg0: i32) -> (i32, i32) {
    %c0_i32 = arith.constant 0 : i32
    %c0_i32_0 = arith.constant 0 : i32
    %c0_i32_1 = arith.constant 0 : i32
    return %c0_i32, %c0_i32_0 : i32, i32
  }
  func.func @transform_4(%arg0: i32) -> (i32, i32, i32) {
    %c0_i32 = arith.constant 0 : i32
    %c0_i32_0 = arith.constant 0 : i32
    %c0_i32_1 = arith.constant 0 : i32
    %c0_i32_2 = arith.constant 0 : i32
    return %c0_i32, %c0_i32_0, %c0_i32_1 : i32, i32, i32
  }
  func.func @transform_5(%arg0: i32) -> (i32, i32, i32) {
    %c0_i32 = arith.constant 0 : i32
    %c0_i32_0 = arith.constant 0 : i32
    %c0_i32_1 = arith.constant 0 : i32
    %c0_i32_2 = arith.constant 0 : i32
    return %c0_i32, %c0_i32_0, %c0_i32_1 : i32, i32, i32
  }
  func.func @transform_6(%arg0: i32) -> (i32, i32, i32) {
    %c0_i32 = arith.constant 0 : i32
    %c0_i32_0 = arith.constant 0 : i32
    %c0_i32_1 = arith.constant 0 : i32
    %c0_i32_2 = arith.constant 0 : i32
    return %c0_i32, %c0_i32_0, %c0_i32_1 : i32, i32, i32
  }
  func.func @transform_7(%arg0: i32) -> (i32, i32, i32) {
    %c0_i32 = arith.constant 0 : i32
    %c0_i32_0 = arith.constant 0 : i32
    %c0_i32_1 = arith.constant 0 : i32
    %c0_i32_2 = arith.constant 0 : i32
    return %c0_i32, %c0_i32_0, %c0_i32_1 : i32, i32, i32
  }
  func.func @transform_8(%arg0: i32) -> (i32, i32, i32) {
    %c0_i32 = arith.constant 0 : i32
    %c0_i32_0 = arith.constant 0 : i32
    %c0_i32_1 = arith.constant 0 : i32
    return %c0_i32, %arg0, %c0_i32_0 : i32, i32, i32
  }
  func.func @transform_9(%arg0: i32) -> (i32, i32, i32) {
    %c0_i32 = arith.constant 0 : i32
    %c0_i32_0 = arith.constant 0 : i32
    %c0_i32_1 = arith.constant 0 : i32
    %c0_i32_2 = arith.constant 0 : i32
    return %c0_i32, %c0_i32_0, %c0_i32_1 : i32, i32, i32
  }
  func.func @transform_10(%arg0: i32) -> (i32, i32) {
    %c0_i32 = arith.constant 0 : i32
    %c0_i32_0 = arith.constant 0 : i32
    %c0_i32_1 = arith.constant 0 : i32
    return %c0_i32, %c0_i32_0 : i32, i32
  }
  func.func @transform_11(%arg0: i32) -> (i32, i32) {
    %c0_i32 = arith.constant 0 : i32
    %c0_i32_0 = arith.constant 0 : i32
    return %arg0, %c0_i32 : i32, i32
  }
}

</mosaic_0001>

<bundles_post_ra>
// kernel: igcn_forward.1
= control target key start
LH: loop header
LB: loop body
LE: loop exit
PB: predicated region body
PF: predicated region fallthrough
CT: control target
= control target key end

     0   :  { %vm60_vm0 = vcmask 130048   ;;  %vm110_vm1 = vcmask 1040384   ;;  %vm111_vm2 = vcmask 1041408   ;;  %v1038_v15 = vmov 65535   ;;  %s1039_s18 = smov 32   ;;  %s1319_s0 = inlined_call_operand.vmem [shape: f32[32,3], index: 0, kind: input, shape index: {}]   ;;  %s1320_s1 = inlined_call_operand.vmem [shape: bf16[16,16], index: 1, kind: input, shape index: {}]   ;;  %s1321_s2 = inlined_call_operand.vmem [shape: bf16[2,3,32], index: 2, kind: input, shape index: {}]   ;;  %s1322_s3 = inlined_call_operand.vmem [shape: f32[1,32], index: 3, kind: input, shape index: {}]   ;;  %s1323_s4 = inlined_call_operand.vmem [shape: bf16[2,64,32], index: 4, kind: input, shape index: {}]   ;;  %s1324_s5 = inlined_call_operand.vmem [shape: f32[2,1,32], index: 5, kind: input, shape index: {}]   ;;  %s1325_s8 = inlined_call_operand.vmem [shape: f32[2,2,32], index: 8, kind: input, shape index: {}]   ;;  %s1326_s6 = inlined_call_operand.vmem [shape: bf16[2,64,32], index: 6, kind: input, shape index: {}]   ;;  %s1327_s7 = inlined_call_operand.vmem [shape: f32[2,1,32], index: 7, kind: input, shape index: {}]   ;;  %s1328_s9 = inlined_call_operand.vmem [shape: bf16[2,32,3], index: 9, kind: input, shape index: {}]   ;;  %s1329_s10 = inlined_call_operand.vmem [shape: f32[1,3], index: 10, kind: input, shape index: {}]   ;;  %s1330_s11 = inlined_call_operand.vmem [shape: f32[32,3], index: 11, kind: output, shape index: {}]  }
   0x1   :  { %v41_v0 = vld [vmem:[%s1319_s0] sm:$0xff]  ;;  %v42_v1 = vld [vmem:[%s1319_s0 + $0x8] sm:$0xff]  ;;  %v43_v2 = vld [vmem:[%s1319_s0 + $0x10] sm:$0xff]  ;;  %v112_v16 = vsel %vm110_vm1, 4294967295, %v1038_v15  ;;  %vm103_vm3 = vcmask 23552   ;;  %vm250_vm4 = vcmask 261120  }
   0x2   :  { %v45_v3 = vpack.c.bf16 %v41_v0, %v41_v0  ;;  %v46_v4 = vpack.c.bf16 %v42_v1, %v42_v1  ;;  %v44_v5 = vld [vmem:[%s1319_s0 + $0x18] sm:$0xff]  ;;  %v47_v6 = vpack.c.bf16 %v43_v2, %v43_v2  ;;  %v1115_v14 = vld [vmem:[%s1320_s1] sm:$0xff]  ;;  %v113_v18 = vsel %vm111_vm2, %v112_v16, 0  ;;  %v1011_v57 = vld [vmem:[%s1323_s4 + $0x10] sm:$0xff] }
   0x3   :  { %v48_v7 = vpack.c.bf16 %v44_v5, %v44_v5  ;;  %v878_v17 = vld [vmem:[%s1321_s2 + $0x2] sm:$0x3]  ;;  %v100_v20 = vld [vmem:[%s1321_s2] sm:$0x3]  ;;  %v1012_v55 = vld [vmem:[%s1323_s4 + $0x18] sm:$0xff]  ;;  %vm284_vm5 = vcmask 523264  }
   0x4   :  { %v56_v8 = vunpack.c.l.b16 %v45_v3  ;;  %v57_v9 = vunpack.c.l.b16 %v46_v4  ;;  %v80_v10 = vunpack.c.l.b16 %v47_v6  ;;  %v115_v19 = vand.u32 %v878_v17, %v113_v18  ;;  %v1032_v33 = vld [vmem:[%s1322_s3] ss:$0 sm:$0xff]  ;;  %v1010_v58 = vld [vmem:[%s1323_s4 + $0x8] sm:$0xff] }
   0x5   :  { %v81_v11 = vunpack.c.l.b16 %v48_v7  ;;  %v143_v21 = vand.u32 %v113_v18, %v100_v20  ;;  %v1009_v62 = vld [vmem:[%s1323_s4] sm:$0xff] }
   0x6   :  { %v58_v12 = vpack.c.b16 %v57_v9, %v56_v8  ;;  %124 = vmatpush.bf16.msra.mxu2 %v115_v19  ;;  %1029 = vmatpush.bf16.msra.mxu3 %v115_v19  ;;  %v172_v17 = vld [vmem:[%s1325_s8] sm:$0x3] }
   0x7   :  { %v82_v13 = vpack.c.b16 %v81_v11, %v80_v10  ;;  %v175_v18 = vperm.slane %v172_v17, 0 }
   0x8   :  { %71 = vmatpush.bf16.msra.mxu0 %v58_v12 }
   0x9   :  { %91 = vmatpush.bf16.msra.mxu1 %v82_v13 }
   0xa   :  { %152 = vmatpush.bf16.msrb.mxu3 %v143_v21 }
   0xb   :  { %876 = vmatmul.msk.bf16.vlgmr.msra.gmra.mxu0 %vm60_vm0, %v1115_v14 }
   0xc   :  { %877 = vmatmul.msk.bf16.vlgmr.msra.gmra.mxu1 %vm60_vm0, %v1115_v14 }
  0x88   :  { %v73_v22 = vpop.f32.mrf.mxu0 }
  0x89   :  { %v93_v23 = vpop.f32.mrf.mxu1 }
  0x90   :  { %v75_v24 = vpop.f32.mrf.mxu0 }
  0x91   :  { %v98_v25 = vpack.c.bf16 %v75_v24, %v73_v22  ;;  %v95_v26 = vpop.f32.mrf.mxu1 }
  0x92   :  { %v99_v27 = vpack.c.bf16 %v95_v26, %v93_v23 }
  0x93   :  { %879 = vmatmul.msk.bf16.vlgmr.msra.gmra.mxu2 %vm103_vm3, %v98_v25 }
  0x94   :  { %880 = vmatmul.msk.bf16.vlgmr.msra.gmra.mxu3 %vm103_vm3, %v99_v27 }
  0xa4   :  { %881 = vmatmul.msk.bf16.vlgmr.msrb.gmra.mxu3 %vm103_vm3, %v58_v12 }
  0xb4   :  { %882 = vmatmul.msk.bf16.gmra.mxu3 %vm103_vm3, %v82_v13  ;;  %v1033_v13 = vld [vmem:[%s1324_s5] ss:$0 sm:$0xff] }
 0x116   :  { %v126_v30 = vpop.f32.mrf.mxu2 }
 0x117   :  { %v131_v28 = vpop.f32.mrf.mxu3 }
 0x11e   :  { %v128_v35 = vpop.f32.mrf.mxu2 }
 0x11f   :  { %v133_v29 = vpop.f32.mrf.mxu3 }
 0x127   :  { %v154_v31 = vpop.f32.mrf.mxu3 }
 0x128   :  { %v155_v32 = vadd.f32 %v154_v31, %v126_v30  ;;  %v174_v30 = vrot.slane %v172_v17, 1 }
 0x12a   :  { %v1134_v34 = vadd.f32 %v1032_v33, %v155_v32 }
 0x12c   :  { %v188_v39 = vpack.c.bf16 %v1134_v34, %v1134_v34 }
 0x12e   :  { %v194_v41 = vunpack.c.l.b16 %v188_v39 }
 0x12f   :  { %v156_v36 = vpop.f32.mrf.mxu3 }
 0x130   :  { %v157_v37 = vadd.f32 %v156_v36, %v128_v35 }
 0x132   :  { %v1136_v38 = vadd.f32 %v1032_v33, %v157_v37 }
 0x134   :  { %v189_v40 = vpack.c.bf16 %v1136_v38, %v1136_v38 }
 0x136   :  { %v195_v42 = vunpack.c.l.b16 %v189_v40 }
 0x137   :  { %v159_v43 = vpop.f32.mrf.mxu3 }
 0x138   :  { %v196_v44 = vpack.c.b16 %v195_v42, %v194_v41  ;;  %v160_v45 = vadd.f32 %v159_v43, %v131_v28 }
 0x13a   :  { %205 = vmatpush.bf16.msrb.mxu0 %v196_v44  ;;  %v1144_v46 = vadd.f32 %v1032_v33, %v160_v45 }
 0x13c   :  { %v190_v50 = vpack.c.bf16 %v1144_v46, %v1144_v46 }
 0x13d   :  { %883 = vmatmul.msk.bf16.vlgmr.msrb.gmra.mxu0 %vm60_vm0, %v1115_v14 }
 0x13e   :  { %v214_v52 = vunpack.c.l.b16 %v190_v50  ;;  %293 = vmatpush.bf16.msra.mxu0 %v1012_v55  ;;  %v1016_v50 = vld [vmem:[%s1326_s6 + $0x18] sm:$0xff] }
 0x13f   :  { %v161_v47 = vpop.f32.mrf.mxu3  ;;  %428 = vmatpush.bf16.msra.mxu3 %v1016_v50 }
 0x140   :  { %v162_v48 = vadd.f32 %v161_v47, %v133_v29 }
 0x142   :  { %v1146_v49 = vadd.f32 %v1032_v33, %v162_v48  ;;  %294 = vmatpush.bf16.msra.mxu0 %v1011_v57  ;;  %v176_v33 = vperm.slane %v174_v30, 0  ;;  %v1014_v57 = vld [vmem:[%s1326_s6 + $0x8] sm:$0xff] }
 0x144   :  { %v191_v51 = vpack.c.bf16 %v1146_v49, %v1146_v49 }
 0x146   :  { %v215_v53 = vunpack.c.l.b16 %v191_v51  ;;  %295 = vmatpush.bf16.msra.mxu0 %v1010_v58 }
 0x148   :  { %v216_v54 = vpack.c.b16 %v215_v53, %v214_v52  ;;  %v1015_v52 = vld [vmem:[%s1326_s6 + $0x10] sm:$0xff] }
 0x149   :  { %429 = vmatpush.bf16.msra.mxu3 %v1015_v52 }
 0x14a   :  { %225 = vmatpush.bf16.msrb.mxu1 %v216_v54  ;;  %296 = vmatpush.bf16.msra.mxu0 %v1009_v62 }
 0x14d   :  { %884 = vmatmul.msk.bf16.vlgmr.msrb.gmra.mxu1 %vm60_vm0, %v1115_v14  ;;  %430 = vmatpush.bf16.msra.mxu3 %v1014_v57  ;;  %v1035_v57 = vld [vmem:[%s1324_s5 + $0x1] ss:$0 sm:$0xff] }
 0x1ba   :  { %v207_v56 = vpop.f32.mrf.mxu0 }
 0x1bb   :  { %v232_v59 = vpack.c.bf16 %v207_v56, %v207_v56 }
 0x1bd   :  { %v240_v63 = vunpack.c.l.b16 %v232_v59  ;;  %v1013_v59 = vld [vmem:[%s1326_s6] sm:$0xff] }
 0x1be   :  { %431 = vmatpush.bf16.msra.mxu3 %v1013_v59 }
 0x1c2   :  { %v209_v60 = vpop.f32.mrf.mxu0 }
 0x1c3   :  { %v233_v61 = vpack.c.bf16 %v209_v60, %v209_v60 }
 0x1c5   :  { %v241_v0 = vunpack.c.l.b16 %v233_v61 }
 0x1c7   :  { %v244_v1 = vpack.c.b16 %v241_v0, %v240_v63 }
 0x1c9   :  { %246 = vrot.lane.b32.xlu0 %v244_v1, %s1039_s18 }
 0x1ca   :  { %v227_v2 = vpop.f32.mrf.mxu1 }
 0x1cb   :  { %v234_v3 = vpack.c.bf16 %v227_v2, %v227_v2 }
 0x1cd   :  { %v242_v6 = vunpack.c.l.b16 %v234_v3 }
 0x1d2   :  { %v229_v4 = vpop.f32.mrf.mxu1 }
 0x1d3   :  { %v235_v5 = vpack.c.bf16 %v229_v4, %v229_v4 }
 0x1d5   :  { %v243_v7 = vunpack.c.l.b16 %v235_v5 }
 0x1d7   :  { %v245_v8 = vpack.c.b16 %v243_v7, %v242_v6  ;;  %v1034_v7 = vld [vmem:[%s1327_s7] ss:$0 sm:$0xff] }
 0x1d9   :  { %248 = vrot.lane.b32.xlu0 %v245_v8, %s1039_s18 }
 0x23b   :  { %v247_v9 = vpop.permute.xlu0 %246 }
 0x23c   :  { %v253_v10 = vsel %vm250_vm4, %v196_v44, %v247_v9 }
 0x23d   :  { %901 = vmatmul.msk.bf16.vlgmr.msra.gmra.mxu0 %vm284_vm5, %v253_v10 }
 0x24b   :  { %v249_v11 = vpop.permute.xlu0 %248 }
 0x24c   :  { %v256_v12 = vsel %vm250_vm4, %v216_v54, %v249_v11 }
 0x24d   :  { %902 = vmatmul.msk.bf16.gmra.mxu0 %vm284_vm5, %v256_v12 }
 0x2ba   :  { %v298_v15 = vpop.f32.mrf.mxu0 }
 0x2bb   :  { %v299_v16 = vadd.f32 %v1033_v13, %v298_v15 }
 0x2bd   :  { %v308_v19 = vmax.f32 %v299_v16, 0.0 }
 0x2bf   :  { %v312_v21 = vadd.f32 %v308_v19, %v175_v18 }
 0x2c1   :  { %v325_v24 = vpack.c.bf16 %v312_v21, %v312_v21 }
 0x2c2   :  { %v300_v20 = vpop.f32.mrf.mxu0 }
 0x2c3   :  { %v301_v22 = vadd.f32 %v1033_v13, %v300_v20  ;;  %v331_v28 = vunpack.c.l.b16 %v325_v24 }
 0x2c5   :  { %v309_v23 = vmax.f32 %v301_v22, 0.0 }
 0x2c7   :  { %v313_v25 = vadd.f32 %v309_v23, %v175_v18 }
 0x2c9   :  { %v326_v26 = vpack.c.bf16 %v313_v25, %v313_v25 }
 0x2ca   :  { %v303_v27 = vpop.f32.mrf.mxu0 }
 0x2cb   :  { %v332_v29 = vunpack.c.l.b16 %v326_v26  ;;  %v304_v31 = vadd.f32 %v1033_v13, %v303_v27 }
 0x2cd   :  { %v333_v32 = vpack.c.b16 %v332_v29, %v331_v28  ;;  %v310_v35 = vmax.f32 %v304_v31, 0.0 }
 0x2cf   :  { %342 = vmatpush.bf16.msra.mxu1 %v333_v32  ;;  %v314_v37 = vadd.f32 %v310_v35, %v176_v33 }
 0x2d1   :  { %v327_v41 = vpack.c.bf16 %v314_v37, %v314_v37 }
 0x2d2   :  { %v305_v36 = vpop.f32.mrf.mxu0  ;;  %903 = vmatmul.msk.bf16.vlgmr.msra.gmra.mxu1 %vm60_vm0, %v1115_v14 }
 0x2d3   :  { %v306_v39 = vadd.f32 %v1033_v13, %v305_v36  ;;  %v351_v44 = vunpack.c.l.b16 %v327_v41  ;;  %v1019_v41 = vld [vmem:[%s1323_s4 + $0x30] sm:$0xff] }
 0x2d5   :  { %v311_v40 = vmax.f32 %v306_v39, 0.0 }
 0x2d7   :  { %v315_v42 = vadd.f32 %v311_v40, %v176_v33 }
 0x2d9   :  { %v328_v43 = vpack.c.bf16 %v315_v42, %v315_v42  ;;  %v1018_v42 = vld [vmem:[%s1323_s4 + $0x28] sm:$0xff] }
 0x2db   :  { %v352_v45 = vunpack.c.l.b16 %v328_v43  ;;  %v1017_v43 = vld [vmem:[%s1323_s4 + $0x20] sm:$0xff] }
 0x2dd   :  { %v353_v47 = vpack.c.b16 %v352_v45, %v351_v44 }
 0x2df   :  { %362 = vmatpush.bf16.msrb.mxu2 %v353_v47 }
 0x2e2   :  { %904 = vmatmul.msk.bf16.vlgmr.msrb.gmra.mxu2 %vm60_vm0, %v1115_v14 }
 0x34f   :  { %v344_v48 = vpop.f32.mrf.mxu1 }
 0x350   :  { %v369_v51 = vpack.c.bf16 %v344_v48, %v344_v48 }
 0x352   :  { %v377_v55 = vunpack.c.l.b16 %v369_v51 }
 0x357   :  { %v346_v53 = vpop.f32.mrf.mxu1 }
 0x358   :  { %v370_v54 = vpack.c.bf16 %v346_v53, %v346_v53 }
 0x35a   :  { %v378_v56 = vunpack.c.l.b16 %v370_v54 }
 0x35c   :  { %v381_v58 = vpack.c.b16 %v378_v56, %v377_v55 }
 0x35e   :  { %383 = vrot.lane.b32.xlu1 %v381_v58, %s1039_s18 }
 0x365   :  { %v364_v60 = vpop.f32.mrf.mxu2 }
 0x366   :  { %v371_v61 = vpack.c.bf16 %v364_v60, %v364_v60  ;;  %v923_v60 = vld [vmem:[%s1325_s8 + $0x2] sm:$0x3] }
 0x368   :  { %v379_v0 = vunpack.c.l.b16 %v371_v61  ;;  %v455_v61 = vperm.slane %v923_v60, 0 }
 0x36d   :  { %v366_v62 = vpop.f32.mrf.mxu2 }
 0x36e   :  { %v372_v63 = vpack.c.bf16 %v366_v62, %v366_v62 }
 0x370   :  { %v380_v1 = vunpack.c.l.b16 %v372_v63 }
 0x372   :  { %v382_v2 = vpack.c.b16 %v380_v1, %v379_v0 }
 0x374   :  { %385 = vrot.lane.b32.xlu1 %v382_v2, %s1039_s18 }
 0x3d0   :  { %v384_v3 = vpop.permute.xlu1 %383 }
 0x3d1   :  { %v389_v4 = vsel %vm250_vm4, %v333_v32, %v384_v3 }
 0x3d2   :  { %921 = vmatmul.msk.bf16.vlgmr.msra.gmra.mxu3 %vm284_vm5, %v389_v4 }
 0x3e6   :  { %v386_v5 = vpop.permute.xlu1 %385 }
 0x3e7   :  { %v392_v6 = vsel %vm250_vm4, %v353_v47, %v386_v5 }
 0x3e8   :  { %922 = vmatmul.msk.bf16.gmra.mxu3 %vm284_vm5, %v392_v6 }
 0x455   :  { %v433_v8 = vpop.f32.mrf.mxu3 }
 0x456   :  { %v434_v9 = vadd.f32 %v1034_v7, %v433_v8 }
 0x458   :  { %v443_v10 = vmax.f32 %v434_v9, 0.0 }
 0x45a   :  { %v1204_v12 = vadd.f32 %v443_v10, %v1134_v34  ;;  %v454_v10 = vrot.slane %v923_v60, 1 }
 0x45c   :  { %v470_v16 = vpack.c.bf16 %v1204_v12, %v1204_v12 }
 0x45d   :  { %v435_v11 = vpop.f32.mrf.mxu3 }
 0x45e   :  { %v436_v13 = vadd.f32 %v1034_v7, %v435_v11  ;;  %v476_v19 = vunpack.c.l.b16 %v470_v16 }
 0x460   :  { %v444_v15 = vmax.f32 %v436_v13, 0.0  ;;  %v456_v13 = vperm.slane %v454_v10, 0 }
 0x462   :  { %v1209_v17 = vadd.f32 %v444_v15, %v1136_v38 }
 0x464   :  { %v471_v18 = vpack.c.bf16 %v1209_v17, %v1209_v17 }
 0x466   :  { %v477_v20 = vunpack.c.l.b16 %v471_v18 }
 0x468   :  { %v478_v21 = vpack.c.b16 %v477_v20, %v476_v19 }
 0x46a   :  { %487 = vmatpush.bf16.msrb.mxu1 %v478_v21 }
 0x46b   :  { %v438_v22 = vpop.f32.mrf.mxu3 }
 0x46c   :  { %v439_v23 = vadd.f32 %v1034_v7, %v438_v22 }
 0x46d   :  { %933 = vmatmul.msk.bf16.vlgmr.msrb.gmra.mxu1 %vm60_vm0, %v1115_v14 }
 0x46e   :  { %v445_v34 = vmax.f32 %v439_v23, 0.0 }
 0x470   :  { %v1216_v25 = vadd.f32 %v445_v34, %v1144_v46 }
 0x472   :  { %v472_v27 = vpack.c.bf16 %v1216_v25, %v1216_v25 }
 0x473   :  { %v440_v24 = vpop.f32.mrf.mxu3 }
 0x474   :  { %v441_v26 = vadd.f32 %v1034_v7, %v440_v24  ;;  %v496_v30 = vunpack.c.l.b16 %v472_v27 }
 0x476   :  { %v446_v38 = vmax.f32 %v441_v26, 0.0 }
 0x478   :  { %v1221_v28 = vadd.f32 %v446_v38, %v1146_v49  ;;  %v1020_v49 = vld [vmem:[%s1323_s4 + $0x38] sm:$0xff] }
 0x479   :  { %573 = vmatpush.bf16.msrb.mxu0 %v1020_v49 }
 0x47a   :  { %v473_v29 = vpack.c.bf16 %v1221_v28, %v1221_v28 }
 0x47c   :  { %v497_v31 = vunpack.c.l.b16 %v473_v29 }
 0x47d   :  { %574 = vmatpush.bf16.msrb.mxu0 %v1019_v41 }
 0x47e   :  { %v498_v32 = vpack.c.b16 %v497_v31, %v496_v30 }
 0x480   :  { %507 = vmatpush.bf16.msra.mxu2 %v498_v32 }
 0x481   :  { %575 = vmatpush.bf16.msrb.mxu0 %v1018_v42 }
 0x483   :  { %934 = vmatmul.msk.bf16.vlgmr.msra.gmra.mxu2 %vm60_vm0, %v1115_v14 }
 0x485   :  { %576 = vmatpush.bf16.msrb.mxu0 %v1017_v43 }
 0x4ea   :  { %v489_v46 = vpop.f32.mrf.mxu1 }
 0x4eb   :  { %v514_v33 = vpack.c.bf16 %v489_v46, %v489_v46 }
 0x4ed   :  { %v522_v37 = vunpack.c.l.b16 %v514_v33  ;;  %v1024_v33 = vld [vmem:[%s1326_s6 + $0x38] sm:$0xff] }
 0x4ee   :  { %710 = vmatpush.bf16.msrb.mxu3 %v1024_v33 }
 0x4f2   :  { %v491_v35 = vpop.f32.mrf.mxu1 }
 0x4f3   :  { %v515_v36 = vpack.c.bf16 %v491_v35, %v491_v35  ;;  %v1023_v35 = vld [vmem:[%s1326_s6 + $0x30] sm:$0xff] }
 0x4f4   :  { %711 = vmatpush.bf16.msrb.mxu3 %v1023_v35 }
 0x4f5   :  { %v523_v39 = vunpack.c.l.b16 %v515_v36  ;;  %v1022_v36 = vld [vmem:[%s1326_s6 + $0x28] sm:$0xff] }
 0x4f7   :  { %v526_v40 = vpack.c.b16 %v523_v39, %v522_v37  ;;  %v1021_v37 = vld [vmem:[%s1326_s6 + $0x20] sm:$0xff] }
 0x4f8   :  { %712 = vmatpush.bf16.msrb.mxu3 %v1022_v36 }
 0x4f9   :  { %528 = vrot.lane.b32.xlu2 %v526_v40, %s1039_s18 }
 0x4fc   :  { %713 = vmatpush.bf16.msrb.mxu3 %v1021_v37 }
 0x506   :  { %v509_v44 = vpop.f32.mrf.mxu2 }
 0x507   :  { %v516_v45 = vpack.c.bf16 %v509_v44, %v509_v44 }
 0x509   :  { %v524_v50 = vunpack.c.l.b16 %v516_v45 }
 0x50e   :  { %v511_v47 = vpop.f32.mrf.mxu2 }
 0x50f   :  { %v517_v48 = vpack.c.bf16 %v511_v47, %v511_v47 }
 0x511   :  { %v525_v51 = vunpack.c.l.b16 %v517_v48 }
 0x513   :  { %v527_v52 = vpack.c.b16 %v525_v51, %v524_v50  ;;  %v1028_v51 = vld [vmem:[%s1328_s9 + $0x18] sm:$0xff] }
 0x515   :  { %530 = vrot.lane.b32.xlu2 %v527_v52, %s1039_s18  ;;  %v1027_v52 = vld [vmem:[%s1328_s9 + $0x10] sm:$0xff] }
 0x553   :  { %v529_v53 = vpop.permute.xlu2 %528 }
 0x554   :  { %v534_v54 = vsel %vm250_vm4, %v478_v21, %v529_v53 }
 0x555   :  { %951 = vmatmul.msk.bf16.vlgmr.msrb.gmra.mxu0 %vm284_vm5, %v534_v54  ;;  %v1036_v54 = vld [vmem:[%s1327_s7 + $0x1] ss:$0 sm:$0xff] }
 0x56f   :  { %v531_v55 = vpop.permute.xlu2 %530 }
 0x570   :  { %v537_v56 = vsel %vm250_vm4, %v498_v32, %v531_v55 }
 0x571   :  { %952 = vmatmul.msk.bf16.gmra.mxu0 %vm284_vm5, %v537_v56 }
 0x5d2   :  { %v578_v58 = vpop.f32.mrf.mxu0 }
 0x5d3   :  { %v579_v59 = vadd.f32 %v1035_v57, %v578_v58 }
 0x5d5   :  { %v588_v62 = vmax.f32 %v579_v59, 0.0 }
 0x5d7   :  { %v592_v0 = vadd.f32 %v588_v62, %v455_v61 }
 0x5d9   :  { %v607_v3 = vpack.c.bf16 %v592_v0, %v592_v0 }
 0x5da   :  { %v580_v63 = vpop.f32.mrf.mxu0 }
 0x5db   :  { %v581_v1 = vadd.f32 %v1035_v57, %v580_v63  ;;  %v613_v6 = vunpack.c.l.b16 %v607_v3 }
 0x5dd   :  { %v589_v2 = vmax.f32 %v581_v1, 0.0 }
 0x5df   :  { %v593_v4 = vadd.f32 %v589_v2, %v455_v61 }
 0x5e1   :  { %v608_v5 = vpack.c.bf16 %v593_v4, %v593_v4 }
 0x5e3   :  { %v614_v7 = vunpack.c.l.b16 %v608_v5 }
 0x5e5   :  { %v615_v8 = vpack.c.b16 %v614_v7, %v613_v6 }
 0x5e7   :  { %624 = vmatpush.bf16.msra.mxu1 %v615_v8 }
 0x5ea   :  { %962 = vmatmul.msk.bf16.vlgmr.msra.gmra.mxu1 %vm60_vm0, %v1115_v14 }
 0x5eb   :  { %768 = vmatpush.bf16.msrb.mxu1 %v1028_v51 }
 0x5ee   :  { %v583_v9 = vpop.f32.mrf.mxu0 }
 0x5ef   :  { %v584_v11 = vadd.f32 %v1035_v57, %v583_v9  ;;  %769 = vmatpush.bf16.msrb.mxu1 %v1027_v52 }
 0x5f1   :  { %v590_v15 = vmax.f32 %v584_v11, 0.0 }
 0x5f3   :  { %v594_v18 = vadd.f32 %v590_v15, %v456_v13 }
 0x5f5   :  { %v609_v21 = vpack.c.bf16 %v594_v18, %v594_v18 }
 0x5f6   :  { %v585_v16 = vpop.f32.mrf.mxu0 }
 0x5f7   :  { %v586_v19 = vadd.f32 %v1035_v57, %v585_v16  ;;  %v633_v34 = vunpack.c.l.b16 %v609_v21 }
 0x5f9   :  { %v591_v20 = vmax.f32 %v586_v19, 0.0 }
 0x5fb   :  { %v595_v22 = vadd.f32 %v591_v20, %v456_v13  ;;  %v1026_v13 = vld [vmem:[%s1328_s9 + $0x8] sm:$0xff] }
 0x5fd   :  { %v610_v23 = vpack.c.bf16 %v595_v22, %v595_v22 }
 0x5ff   :  { %v634_v24 = vunpack.c.l.b16 %v610_v23 }
 0x601   :  { %v635_v26 = vpack.c.b16 %v634_v24, %v633_v34  ;;  %v1037_v24 = vld [vmem:[%s1329_s10] ss:$0 sm:$0xff] }
 0x603   :  { %644 = vmatpush.bf16.msrb.mxu2 %v635_v26 }
 0x606   :  { %963 = vmatmul.msk.bf16.vlgmr.msrb.gmra.mxu2 %vm60_vm0, %v1115_v14 }
 0x667   :  { %v626_v38 = vpop.f32.mrf.mxu1 }
 0x668   :  { %v651_v27 = vpack.c.bf16 %v626_v38, %v626_v38 }
 0x66a   :  { %v659_v31 = vunpack.c.l.b16 %v651_v27 }
 0x66f   :  { %v628_v29 = vpop.f32.mrf.mxu1 }
 0x670   :  { %v652_v30 = vpack.c.bf16 %v628_v29, %v628_v29 }
 0x672   :  { %v660_v32 = vunpack.c.l.b16 %v652_v30 }
 0x674   :  { %v663_v46 = vpack.c.b16 %v660_v32, %v659_v31 }
 0x676   :  { %665 = vrot.lane.b32.xlu0 %v663_v46, %s1039_s18 }
 0x689   :  { %v646_v39 = vpop.f32.mrf.mxu2 }
 0x68a   :  { %v653_v49 = vpack.c.bf16 %v646_v39, %v646_v39 }
 0x68c   :  { %v661_v42 = vunpack.c.l.b16 %v653_v49 }
 0x691   :  { %v648_v40 = vpop.f32.mrf.mxu2 }
 0x692   :  { %v654_v41 = vpack.c.bf16 %v648_v40, %v648_v40 }
 0x694   :  { %v662_v43 = vunpack.c.l.b16 %v654_v41 }
 0x696   :  { %v664_v44 = vpack.c.b16 %v662_v43, %v661_v42 }
 0x698   :  { %667 = vrot.lane.b32.xlu1 %v664_v44, %s1039_s18 }
 0x6e8   :  { %v666_v45 = vpop.permute.xlu0 %665 }
 0x6e9   :  { %v671_v47 = vsel %vm250_vm4, %v615_v8, %v666_v45 }
 0x6ea   :  { %980 = vmatmul.msk.bf16.vlgmr.msrb.gmra.mxu3 %vm284_vm5, %v671_v47 }
 0x70a   :  { %v668_v48 = vpop.permute.xlu1 %667 }
 0x70b   :  { %v674_v50 = vsel %vm250_vm4, %v635_v26, %v668_v48 }
 0x70c   :  { %981 = vmatmul.msk.bf16.gmra.mxu3 %vm284_vm5, %v674_v50 }
 0x76d   :  { %v715_v53 = vpop.f32.mrf.mxu3 }
 0x76e   :  { %v716_v55 = vadd.f32 %v1036_v54, %v715_v53 }
 0x770   :  { %v725_v57 = vmax.f32 %v716_v55, 0.0 }
 0x772   :  { %v729_v60 = vadd.f32 %v725_v57, %v1204_v12 }
 0x775   :  { %v717_v56 = vpop.f32.mrf.mxu3 }
 0x776   :  { %v718_v58 = vadd.f32 %v1036_v54, %v717_v56 }
 0x778   :  { %v726_v59 = vmax.f32 %v718_v58, 0.0 }
 0x77a   :  { %v730_v61 = vadd.f32 %v726_v59, %v1209_v17 }
 0x77c   :  { %v733_v62 = vpack.c.bf16 %v730_v61, %v729_v60 }
 0x77e   :  { %994 = vmatmul.msk.bf16.vlgmr.msrb.gmra.mxu1 %vm250_vm4, %v733_v62 }
 0x78f   :  { %v720_v63 = vpop.f32.mrf.mxu3 }
 0x790   :  { %v721_v0 = vadd.f32 %v1036_v54, %v720_v63 }
 0x792   :  { %v727_v2 = vmax.f32 %v721_v0, 0.0 }
 0x794   :  { %v731_v5 = vadd.f32 %v727_v2, %v1216_v25  ;;  %v1025_v25 = vld [vmem:[%s1328_s9] sm:$0xff] }
 0x797   :  { %v722_v1 = vpop.f32.mrf.mxu3 }
 0x798   :  { %v723_v3 = vadd.f32 %v1036_v54, %v722_v1 }
 0x79a   :  { %v728_v4 = vmax.f32 %v723_v3, 0.0 }
 0x79c   :  { %v732_v6 = vadd.f32 %v728_v4, %v1221_v28 }
 0x79e   :  { %v734_v7 = vpack.c.bf16 %v732_v6, %v731_v5 }
 0x7a0   :  { %995 = vmatmul.msk.bf16.gmra.mxu1 %vm250_vm4, %v734_v7 }
 0x7fb   :  { %v771_v8 = vpop.f32.mrf.mxu1 }
 0x7fc   :  { %v781_v12 = vpack.c.bf16 %v771_v8, %v771_v8 }
 0x7fe   :  { %v787_v10 = vunpack.c.l.b16 %v781_v12 }
 0x803   :  { %v773_v9 = vpop.f32.mrf.mxu1 }
 0x804   :  { %v782_v17 = vpack.c.bf16 %v773_v9, %v773_v9 }
 0x806   :  { %v788_v11 = vunpack.c.l.b16 %v782_v17 }
 0x808   :  { %v789_v15 = vpack.c.b16 %v788_v11, %v787_v10 }
 0x80a   :  { %798 = vmatpush.bf16.msra.mxu2 %v789_v15 }
 0x80d   :  { %996 = vmatmul.msk.bf16.vlgmr.msra.gmra.mxu2 %vm60_vm0, %v1115_v14 }
 0x80e   :  { %843 = vmatpush.bf16.msrb.mxu2 %v1026_v13 }
 0x812   :  { %844 = vmatpush.bf16.msrb.mxu2 %v1025_v25 }
 0x81d   :  { %v776_v28 = vpop.f32.mrf.mxu1  ;;  %1006 = vmatmul.msk.bf16.vlgmr.msrb.gmra.mxu2 %vm250_vm4, %v733_v62 }
 0x81e   :  { %v783_v16 = vpack.c.bf16 %v776_v28, %v776_v28 }
 0x820   :  { %v807_v20 = vunpack.c.l.b16 %v783_v16 }
 0x825   :  { %v778_v18 = vpop.f32.mrf.mxu1 }
 0x826   :  { %v784_v19 = vpack.c.bf16 %v778_v18, %v778_v18 }
 0x828   :  { %v808_v21 = vunpack.c.l.b16 %v784_v19 }
 0x82a   :  { %v809_v22 = vpack.c.b16 %v808_v21, %v807_v20 }
 0x82c   :  { %818 = vmatpush.bf16.msra.mxu0 %v809_v22 }
 0x82d   :  { %1007 = vmatmul.msk.bf16.gmra.mxu2 %vm250_vm4, %v734_v7 }
 0x82f   :  { %997 = vmatmul.msk.bf16.vlgmr.msra.gmra.mxu0 %vm60_vm0, %v1115_v14 }
 0x890   :  { %v800_v23 = vpop.f32.mrf.mxu2 }
 0x898   :  { %v802_v34 = vpop.f32.mrf.mxu2 }
 0x8a0   :  { %v846_v26 = vpop.f32.mrf.mxu2 }
 0x8a1   :  { %v847_v38 = vadd.f32 %v846_v26, %v800_v23 }
 0x8a3   :  { %v860_v27 = vadd.f32 %v1037_v24, %v847_v38 }
 0x8a5   :  { %864 = vst.msk [vmem:[%s1330_s11] sm:$0xff] %vm103_vm3, %v860_v27 }
 0x8a8   :  { %v848_v29 = vpop.f32.mrf.mxu2 }
 0x8a9   :  { %v849_v30 = vadd.f32 %v848_v29, %v802_v34 }
 0x8ab   :  { %v861_v31 = vadd.f32 %v1037_v24, %v849_v30 }
 0x8ac   :  { %v820_v14 = vpop.f32.mrf.mxu0 }
 0x8ad   :  { %865 = vst.msk [vmem:[%s1330_s11 + $0x8] sm:$0xff] %vm103_vm3, %v861_v31 }
 0x8b0   :  { %v851_v32 = vpop.f32.mrf.mxu2 }
 0x8b1   :  { %v852_v46 = vadd.f32 %v851_v32, %v820_v14 }
 0x8b3   :  { %v862_v33 = vadd.f32 %v1037_v24, %v852_v46 }
 0x8b4   :  { %v822_v35 = vpop.f32.mrf.mxu0 }
 0x8b5   :  { %866 = vst.msk [vmem:[%s1330_s11 + $0x10] sm:$0xff] %vm103_vm3, %v862_v33 }
 0x8b8   :  { %v853_v36 = vpop.f32.mrf.mxu2 }
 0x8b9   :  { %v854_v37 = vadd.f32 %v853_v36, %v822_v35 }
 0x8bb   :  { %v863_v39 = vadd.f32 %v1037_v24, %v854_v37 }
 0x8bd   :  { %867 = vst.msk [vmem:[%s1330_s11 + $0x18] sm:$0xff] %vm103_vm3, %v863_v39 }

</bundles_post_ra>
